<compile_context>
chip_gen: v7x
topology: tpu7x:2x2x1
jax: 0.10.0
libtpu: 0.0.40
codegen_flags: <defaults>
</compile_context>

<pallas_src>
import jax
import jax.numpy as jnp
from jax import lax
from jax.experimental import pallas as pl
from jax.experimental.pallas import tpu as pltpu


# ------------------------------------------------------------------ kernel ---
def ppo_eval_kernel(combined_ref, action_ref, w1_ref, b1_ref, w2_ref, b2_ref,
                    out_ref):
    c = combined_ref[...]                                                # [TB, C] f32

    # ---- fused first layer (actor | critic): Linear -> ReLU -------------------
    h = jnp.dot(c, w1_ref[...], preferred_element_type=jnp.float32) + b1_ref[...]
    h = jnp.maximum(h, 0.0)                                              # [TB, 2H]

    # ---- fused second layer (block-diagonal): [actor logits | critic value] ---
    z = jnp.dot(h, w2_ref[...], preferred_element_type=jnp.float32) + b2_ref[...]
    A = w2_ref.shape[1] - 1                                              # static
    logits = z[:, :A]                                                    # [TB, A]
    value = z[:, A:A + 1]                                                # [TB, 1]

    # ---- numerically-stable softmax / log-softmax ------------------------------
    m = jnp.max(logits, axis=-1, keepdims=True)                          # XLU reduce
    e = jnp.exp(logits - m)                                              # EUP
    s = jnp.sum(e, axis=-1, keepdims=True)
    inv_s = pl.reciprocal(s, approx=False)                               # EUP slot
    probs = e * inv_s                                                    # [TB, A]
    logp = (logits - m) - jnp.log(s)                                     # [TB, A]

    # ---- Categorical.log_prob(action) and entropy ------------------------------
    TB = logits.shape[0]
    col_ids = lax.broadcasted_iota(jnp.int32, (TB, A), 1)
    onehot = (col_ids == action_ref[...]).astype(jnp.float32)            # action: [TB, 1]
    logprob = jnp.sum(logp * onehot, axis=-1, keepdims=True)             # [TB, 1]
    entropy = -jnp.sum(probs * logp, axis=-1, keepdims=True)             # [TB, 1]

    # ---- single packed output: [probs | logprob | value | entropy] -------------
    out_ref[...] = jnp.concatenate([probs, logprob, value, entropy], axis=-1)


# ----------------------------------------------------------------- wrapper ---
def evaluate_pallas(state, action, params, *, tb=None):
    """Pallas implementation of AugmentedActorCriticPPO.evaluate()."""
    # Glue: embedding lookup, augmented-feature lookup (log_q_a_s[state]), concat.
    emb = params["embedding"][state]                     # [B, 64]
    aug = params["log_q_a_s"][state]                     # [B, a_nvals]  (squeeze(0) analogue)
    combined = jnp.concatenate([emb, aug], axis=-1).astype(jnp.float32)  # [B, C]

    B, C = combined.shape
    H = params["wa1"].shape[1]
    A = params["wa2"].shape[1]

    # --- fuse weights / biases once per call (cheap wrapper-side plumbing) ------
    w1 = jnp.concatenate([params["wa1"], params["wc1"]], axis=1)         # [C, 2H]
    b1 = jnp.concatenate([params["ba1"], params["bc1"]], axis=1)         # [1, 2H]
    w2 = jnp.zeros((2 * H, A + 1), jnp.float32)                          # block-diagonal
    w2 = w2.at[:H, :A].set(params["wa2"])
    w2 = w2.at[H:, A:].set(params["wc2"])                                # [2H, A+1]
    b2 = jnp.concatenate([params["ba2"], params["bc2"]], axis=1)         # [1, A+1]

    # --- batch tiling: TB multiple of 8, big tiles to amortize per-step cost ----
    def round8(n):
        return max(8, ((n + 7) // 8) * 8)

    if tb is None:
        TB = 512 if B >= 512 else round8(B)
    else:
        TB = round8(min(tb, B))
    B_pad = ((B + TB - 1) // TB) * TB
    pad = B_pad - B

    combined_p = jnp.pad(combined, ((0, pad), (0, 0)))
    action2d = jnp.pad(action.astype(jnp.int32), (0, pad)).reshape(B_pad, 1)

    W = A + 3                                                            # packed output width
    grid = (B_pad // TB,)

    out = pl.pallas_call(
        ppo_eval_kernel,
        grid=grid,
        out_shape=jax.ShapeDtypeStruct((B_pad, W), jnp.float32),
        in_specs=[
            pl.BlockSpec((TB, C), lambda i: (i, 0)),          # combined  (batch-tiled)
            pl.BlockSpec((TB, 1), lambda i: (i, 0)),          # action    (batch-tiled)
            pl.BlockSpec((C, 2 * H), lambda i: (0, 0)),       # fused W1  (resident)
            pl.BlockSpec((1, 2 * H), lambda i: (0, 0)),       # fused b1  (resident)
            pl.BlockSpec((2 * H, A + 1), lambda i: (0, 0)),   # fused W2  (resident)
            pl.BlockSpec((1, A + 1), lambda i: (0, 0)),       # fused b2  (resident)
        ],
        out_specs=pl.BlockSpec((TB, W), lambda i: (i, 0)),
        compiler_params=pltpu.CompilerParams(
            dimension_semantics=("parallel",)),               # v7x: shard batch over 2 TCs
    )(combined_p, action2d, w1, b1, w2, b2)

    probs = out[:B, :A]           # dist.probs
    logprob = out[:B, A]          # dist.log_prob(action)
    value = out[:B, A + 1]        # critic value, squeezed
    entropy = out[:B, A + 2]      # dist.entropy()
    return logprob, value, entropy, probs


# --------------------------------------------------------------- reference ---
def evaluate_ref(state, action, params):
    emb = params["embedding"][state]
    aug = params["log_q_a_s"][state]
    combined = jnp.concatenate([emb, aug], axis=-1).astype(jnp.float32)
    h_a = jax.nn.relu(combined @ params["wa1"] + params["ba1"])
    logits = h_a @ params["wa2"] + params["ba2"]
    probs = jax.nn.softmax(logits, axis=-1)
    logp = jax.nn.log_softmax(logits, axis=-1)
    lp = jnp.take_along_axis(logp, action[:, None], axis=-1)[:, 0]
    ent = -jnp.sum(probs * logp, axis=-1)
    h_c = jax.nn.relu(combined @ params["wc1"] + params["bc1"])
    val = (h_c @ params["wc2"] + params["bc2"])[:, 0]
    return lp, val, ent, probs


# --------------------------------------------------------------------- main ---
if __name__ == "__main__":
    # Small, deterministic configuration consistent with the module's __init__.
    STATE_DIM = 16          # nn.Embedding(state_dim, 64)
    EMBED_DIM = 64
    A_NVALS = 8             # augmented_model.a_nvals
    COMBINED = EMBED_DIM + A_NVALS
    HIDDEN = 256
    ACTION_DIM = 4

    key = jax.random.PRNGKey(0)
    ks = jax.random.split(key, 12)

    # Synthetic augmented_model.log_q_a_s(): log-softmax over a random table.
    raw_q = jax.random.normal(ks[0], (STATE_DIM, A_NVALS), dtype=jnp.float32)
    log_q_a_s = jax.nn.log_softmax(raw_q, axis=-1)

    params = {
        "embedding": 0.1 * jax.random.normal(ks[1], (STATE_DIM, EMBED_DIM), jnp.float32),
        "log_q_a_s": log_q_a_s,
        # actor: Linear(C,256) -> ReLU -> Linear(256,A) -> Softmax
        "wa1": 0.1 * jax.random.normal(ks[2], (COMBINED, HIDDEN), jnp.float32),
        "ba1": 0.1 * jax.random.normal(ks[3], (1, HIDDEN), jnp.float32),
        "wa2": 0.1 * jax.random.normal(ks[4], (HIDDEN, ACTION_DIM), jnp.float32),
        "ba2": 0.1 * jax.random.normal(ks[5], (1, ACTION_DIM), jnp.float32),
        # critic: Linear(C,256) -> ReLU -> Linear(256,1)
        "wc1": 0.1 * jax.random.normal(ks[6], (COMBINED, HIDDEN), jnp.float32),
        "bc1": 0.1 * jax.random.normal(ks[7], (1, HIDDEN), jnp.float32),
        "wc2": 0.1 * jax.random.normal(ks[8], (HIDDEN, 1), jnp.float32),
        "bc2": 0.1 * jax.random.normal(ks[9], (1, 1), jnp.float32),
    }

    # --- test 1: small batch, single grid step ---------------------------------
    B1 = 8
    state1 = jax.random.randint(ks[10], (B1,), 0, STATE_DIM, dtype=jnp.int32)
    action1 = jax.random.randint(ks[11], (B1,), 0, ACTION_DIM, dtype=jnp.int32)
    out1 = jax.block_until_ready(evaluate_pallas(state1, action1, params))
    ref1 = evaluate_ref(state1, action1, params)
    for o, r in zip(out1, ref1):
        assert jnp.allclose(o, r, atol=1e-5, rtol=1e-5), (o, r)

    # --- test 2: exercises multi-step batch tiling + ragged padding ------------
    B2 = 27
    k2a, k2b = jax.random.split(jax.random.PRNGKey(1))
    state2 = jax.random.randint(k2a, (B2,), 0, STATE_DIM, dtype=jnp.int32)
    action2 = jax.random.randint(k2b, (B2,), 0, ACTION_DIM, dtype=jnp.int32)
    out2 = jax.block_until_ready(evaluate_pallas(state2, action2, params, tb=8))
    ref2 = evaluate_ref(state2, action2, params)
    for o, r in zip(out2, ref2):
        assert jnp.allclose(o, r, atol=1e-5, rtol=1e-5), (o, r)

    # TODO(synk): Categorical sampling in `act()` (dist.sample) is stochastic host-side
    # control flow and is left out of the kernel; only the deterministic evaluate()
    # forward math is implemented.
    print("KERNEL_OK")
</pallas_src>

<mosaic_0001>
module attributes {stable_mosaic.version = 11 : i64} {
  func.func @ppo_eval_kernel(%arg0: i32, %arg1: memref<8x72xf32, #tpu.memory_space<vmem>>, %arg2: memref<8x1xi32, #tpu.memory_space<vmem>>, %arg3: memref<72x512xf32, #tpu.memory_space<vmem>>, %arg4: memref<1x512xf32, #tpu.memory_space<vmem>>, %arg5: memref<512x5xf32, #tpu.memory_space<vmem>>, %arg6: memref<1x5xf32, #tpu.memory_space<vmem>>, %arg7: memref<8x7xf32, #tpu.memory_space<vmem>>) attributes {dimension_semantics = [#tpu.dimension_semantics<parallel>], iteration_bounds = array<i64: 1>, scalar_prefetch = 0 : i64, scratch_operands = 0 : i64, tpu.core_type = #tpu.core_type<tc>, window_params = [{transform_indices = @transform_0, window_bounds = array<i64: 8, 72>}, {transform_indices = @transform_1, window_bounds = array<i64: 8, 1>}, {pipeline_mode = #tpu.pipeline_mode<synchronous>, transform_indices = @transform_2, window_bounds = array<i64: 72, 512>}, {pipeline_mode = #tpu.pipeline_mode<synchronous>, transform_indices = @transform_3, window_bounds = array<i64: 1, 512>}, {pipeline_mode = #tpu.pipeline_mode<synchronous>, transform_indices = @transform_4, window_bounds = array<i64: 512, 5>}, {pipeline_mode = #tpu.pipeline_mode<synchronous>, transform_indices = @transform_5, window_bounds = array<i64: 1, 5>}, {transform_indices = @transform_6, window_bounds = array<i64: 8, 7>}]} {
    %c0 = arith.constant 0 : index
    %c0_0 = arith.constant 0 : index
    %0 = vector.load %arg1[%c0, %c0_0] : memref<8x72xf32, #tpu.memory_space<vmem>>, vector<8x72xf32>
    %c0_1 = arith.constant 0 : index
    %c0_2 = arith.constant 0 : index
    %1 = vector.load %arg3[%c0_1, %c0_2] : memref<72x512xf32, #tpu.memory_space<vmem>>, vector<72x512xf32>
    %cst = arith.constant dense<0.000000e+00> : vector<8x512xf32>
    %2 = tpu.matmul %0, %1, %cst {dimension_numbers = #tpu.dot_dimension_numbers<[1], [0], [0], [1], [0, 0, 1, 1], [], []>} : vector<8x72xf32>, vector<72x512xf32>, vector<8x512xf32> -> vector<8x512xf32>
    %c0_3 = arith.constant 0 : index
    %c0_4 = arith.constant 0 : index
    %3 = vector.load %arg4[%c0_3, %c0_4] : memref<1x512xf32, #tpu.memory_space<vmem>>, vector<1x512xf32>
    %4 = vector.broadcast %3 : vector<1x512xf32> to vector<8x512xf32>
    %5 = arith.addf %2, %4 : vector<8x512xf32>
    %cst_5 = arith.constant 0.000000e+00 : f32
    %6 = vector.broadcast %cst_5 : f32 to vector<8x512xf32>
    %7 = arith.maximumf %5, %6 : vector<8x512xf32>
    %c0_6 = arith.constant 0 : index
    %c0_7 = arith.constant 0 : index
    %8 = vector.load %arg5[%c0_6, %c0_7] : memref<512x5xf32, #tpu.memory_space<vmem>>, vector<512x5xf32>
    %cst_8 = arith.constant dense<0.000000e+00> : vector<8x5xf32>
    %9 = tpu.matmul %7, %8, %cst_8 {dimension_numbers = #tpu.dot_dimension_numbers<[1], [0], [0], [1], [0, 0, 1, 1], [], []>} : vector<8x512xf32>, vector<512x5xf32>, vector<8x5xf32> -> vector<8x5xf32>
    %c0_9 = arith.constant 0 : index
    %c0_10 = arith.constant 0 : index
    %10 = vector.load %arg6[%c0_9, %c0_10] : memref<1x5xf32, #tpu.memory_space<vmem>>, vector<1x5xf32>
    %11 = vector.broadcast %10 : vector<1x5xf32> to vector<8x5xf32>
    %12 = arith.addf %9, %11 : vector<8x5xf32>
    %13 = vector.extract_strided_slice %12 {offsets = [0, 0], sizes = [8, 4], strides = [1, 1]} : vector<8x5xf32> to vector<8x4xf32>
    %14 = vector.extract_strided_slice %12 {offsets = [0, 4], sizes = [8, 1], strides = [1, 1]} : vector<8x5xf32> to vector<8x1xf32>
    %cst_11 = arith.constant dense<0xFF800000> : vector<8xf32>
    %15 = vector.multi_reduction <maximumf>, %13, %cst_11 [1] : vector<8x4xf32> to vector<8xf32>
    %16 = vector.shape_cast %15 : vector<8xf32> to vector<8x1xf32>
    %17 = vector.broadcast %16 : vector<8x1xf32> to vector<8x4xf32>
    %18 = arith.subf %13, %17 : vector<8x4xf32>
    %19 = math.exp %18 : vector<8x4xf32>
    %cst_12 = arith.constant dense<0.000000e+00> : vector<8xf32>
    %20 = vector.multi_reduction <add>, %19, %cst_12 [1] : vector<8x4xf32> to vector<8xf32>
    %21 = vector.shape_cast %20 : vector<8xf32> to vector<8x1xf32>
    %22 = tpu.reciprocal %21 : vector<8x1xf32> -> vector<8x1xf32>
    %23 = vector.broadcast %22 : vector<8x1xf32> to vector<8x4xf32>
    %24 = arith.mulf %19, %23 : vector<8x4xf32>
    %25 = vector.broadcast %16 : vector<8x1xf32> to vector<8x4xf32>
    %26 = arith.subf %13, %25 : vector<8x4xf32>
    %27 = math.log %21 : vector<8x1xf32>
    %28 = vector.broadcast %27 : vector<8x1xf32> to vector<8x4xf32>
    %29 = arith.subf %26, %28 : vector<8x4xf32>
    %30 = tpu.iota {dimensions = array<i32: 1>} : vector<8x4xi32>
    %c0_13 = arith.constant 0 : index
    %c0_14 = arith.constant 0 : index
    %31 = vector.load %arg2[%c0_13, %c0_14] : memref<8x1xi32, #tpu.memory_space<vmem>>, vector<8x1xi32>
    %32 = vector.broadcast %31 : vector<8x1xi32> to vector<8x4xi32>
    %33 = arith.cmpi eq, %30, %32 : vector<8x4xi32>
    %34 = arith.extui %33 : vector<8x4xi1> to vector<8x4xi32>
    %35 = arith.sitofp %34 : vector<8x4xi32> to vector<8x4xf32>
    %36 = arith.mulf %29, %35 : vector<8x4xf32>
    %cst_15 = arith.constant dense<0.000000e+00> : vector<8xf32>
    %37 = vector.multi_reduction <add>, %36, %cst_15 [1] : vector<8x4xf32> to vector<8xf32>
    %38 = vector.shape_cast %37 : vector<8xf32> to vector<8x1xf32>
    %39 = arith.mulf %24, %29 : vector<8x4xf32>
    %cst_16 = arith.constant dense<0.000000e+00> : vector<8xf32>
    %40 = vector.multi_reduction <add>, %39, %cst_16 [1] : vector<8x4xf32> to vector<8xf32>
    %41 = vector.shape_cast %40 : vector<8xf32> to vector<8x1xf32>
    %cst_17 = arith.constant 0.000000e+00 : f32
    %42 = vector.broadcast %cst_17 : f32 to vector<8x1xf32>
    %43 = arith.subf %42, %41 : vector<8x1xf32>
    %44 = tpu.concatenate %24, %38, %14, %43 in 1 : vector<8x4xf32>, vector<8x1xf32>, vector<8x1xf32>, vector<8x1xf32> -> vector<8x7xf32>
    %c0_18 = arith.constant 0 : index
    %c0_19 = arith.constant 0 : index
    %45 = vector.load %arg7[%c0_18, %c0_19] : memref<8x7xf32, #tpu.memory_space<vmem>>, vector<8x7xf32>
    tpu.vector_store %arg7[%c0_18, %c0_19], %44 {strides = array<i32>} : memref<8x7xf32, #tpu.memory_space<vmem>>, vector<8x7xf32>,
    return
  }
  func.func @transform_0(%arg0: i32) -> (i32, i32) {
    %c0_i32 = arith.constant 0 : i32
    %c0_i32_0 = arith.constant 0 : i32
    return %arg0, %c0_i32 : i32, i32
  }
  func.func @transform_1(%arg0: i32) -> (i32, i32) {
    %c0_i32 = arith.constant 0 : i32
    %c0_i32_0 = arith.constant 0 : i32
    return %arg0, %c0_i32 : i32, i32
  }
  func.func @transform_2(%arg0: i32) -> (i32, i32) {
    %c0_i32 = arith.constant 0 : i32
    %c0_i32_0 = arith.constant 0 : i32
    %c0_i32_1 = arith.constant 0 : i32
    return %c0_i32, %c0_i32_0 : i32, i32
  }
  func.func @transform_3(%arg0: i32) -> (i32, i32) {
    %c0_i32 = arith.constant 0 : i32
    %c0_i32_0 = arith.constant 0 : i32
    %c0_i32_1 = arith.constant 0 : i32
    return %c0_i32, %c0_i32_0 : i32, i32
  }
  func.func @transform_4(%arg0: i32) -> (i32, i32) {
    %c0_i32 = arith.constant 0 : i32
    %c0_i32_0 = arith.constant 0 : i32
    %c0_i32_1 = arith.constant 0 : i32
    return %c0_i32, %c0_i32_0 : i32, i32
  }
  func.func @transform_5(%arg0: i32) -> (i32, i32) {
    %c0_i32 = arith.constant 0 : i32
    %c0_i32_0 = arith.constant 0 : i32
    %c0_i32_1 = arith.constant 0 : i32
    return %c0_i32, %c0_i32_0 : i32, i32
  }
  func.func @transform_6(%arg0: i32) -> (i32, i32) {
    %c0_i32 = arith.constant 0 : i32
    %c0_i32_0 = arith.constant 0 : i32
    return %arg0, %c0_i32 : i32, i32
  }
}

</mosaic_0001>

<bundles_post_ra>
// kernel: tpu_custom_call.1
= control target key start
LH: loop header
LB: loop body
LE: loop exit
PB: predicated region body
PF: predicated region fallthrough
CT: control target
= control target key end

     0   :  { %v708_v7 = vmov 0.0   ;;  %vm83_vm0 = vcmask 588800   ;;  %s1081_s0 = inlined_call_operand.vmem [shape: f32[8,72], index: 0, kind: input, shape index: {}]   ;;  %s1082_s1 = inlined_call_operand.vmem [shape: s32[8,1], index: 1, kind: input, shape index: {}]   ;;  %s1083_s2 = inlined_call_operand.vmem [shape: f32[72,512], index: 2, kind: input, shape index: {}]   ;;  %s1084_s3 = inlined_call_operand.vmem [shape: f32[1,512], index: 3, kind: input, shape index: {}]   ;;  %s1085_s4 = inlined_call_operand.vmem [shape: f32[512,5], index: 4, kind: input, shape index: {}]   ;;  %s1086_s5 = inlined_call_operand.vmem [shape: f32[1,5], index: 5, kind: input, shape index: {}]   ;;  %s1087_s6 = inlined_call_operand.hbm [shape: f32[8,7], index: 6, kind: output, shape index: {}]  }
   0x1   :  { %v26_v0 = vld [vmem:[%s1083_s2 + $0x8] sm:$0xff]  ;;  %v28_v2 = vld [vmem:[%s1083_s2 + $0x18] sm:$0xff]  ;;  %v25_v5 = vld [vmem:[%s1083_s2] sm:$0xff]  ;;  %151 = vmatprep.mubr.f32.mxu0 %v708_v7  ;;  %222 = vmatprep.mubr.f32.mxu1 %v708_v7 }
   0x2   :  { %v30_v1 = vld [vmem:[%s1083_s2 + $0x28] sm:$0xff]  ;;  %v32_v4 = vld [vmem:[%s1083_s2 + $0x38] sm:$0xff]  ;;  %v29_v6 = vld [vmem:[%s1083_s2 + $0x20] sm:$0xff] }
   0x3   :  { %v576_v3 = vpack.c.bf16 %v30_v1, %v26_v0  ;;  %v592_v8 = vpack.c.bf16 %v32_v4, %v28_v2  ;;  %v578_v9 = vpack.c.bf16 %v29_v6, %v25_v5  ;;  %v27_v10 = vld [vmem:[%s1083_s2 + $0x10] sm:$0xff]  ;;  %v34_v12 = vld [vmem:[%s1083_s2 + $0x48] sm:$0xff]  ;;  %v36_v15 = vld [vmem:[%s1083_s2 + $0x58] sm:$0xff] }
   0x4   :  { %v31_v11 = vld [vmem:[%s1083_s2 + $0x30] sm:$0xff]  ;;  %v38_v14 = vld [vmem:[%s1083_s2 + $0x68] sm:$0xff]  ;;  %v40_v16 = vld [vmem:[%s1083_s2 + $0x78] sm:$0xff] }
   0x5   :  { %577 = vmatprep.subr.bf16.mxu0 %v576_v3  ;;  %v594_v13 = vpack.c.bf16 %v31_v11, %v27_v10  ;;  %593 = vmatprep.subr.bf16.mxu1 %v592_v8  ;;  %v580_v17 = vpack.c.bf16 %v38_v14, %v34_v12  ;;  %v596_v18 = vpack.c.bf16 %v40_v16, %v36_v15  ;;  %v33_v19 = vld [vmem:[%s1083_s2 + $0x40] sm:$0xff]  ;;  %v35_v21 = vld [vmem:[%s1083_s2 + $0x50] sm:$0xff]  ;;  %v42_v24 = vld [vmem:[%s1083_s2 + $0x88] sm:$0xff] }
   0x6   :  { %579 = vmatpush1.bf16.msra.mxu0 %v578_v9  ;;  %v37_v20 = vld [vmem:[%s1083_s2 + $0x60] sm:$0xff]  ;;  %v39_v23 = vld [vmem:[%s1083_s2 + $0x70] sm:$0xff]  ;;  %v46_v25 = vld [vmem:[%s1083_s2 + $0xa8] sm:$0xff] }
   0x7   :  { %595 = vmatpush1.bf16.msra.mxu1 %v594_v13  ;;  %v582_v22 = vpack.c.bf16 %v37_v20, %v33_v19  ;;  %581 = vmatprep.subr.bf16.mxu0 %v580_v17  ;;  %v598_v26 = vpack.c.bf16 %v39_v23, %v35_v21  ;;  %v584_v27 = vpack.c.bf16 %v46_v25, %v42_v24  ;;  %v44_v28 = vld [vmem:[%s1083_s2 + $0x98] sm:$0xff]  ;;  %v41_v30 = vld [vmem:[%s1083_s2 + $0x80] sm:$0xff]  ;;  %v43_v33 = vld [vmem:[%s1083_s2 + $0x90] sm:$0xff] }
   0x8   :  { %597 = vmatprep.subr.bf16.mxu1 %v596_v18  ;;  %v48_v29 = vld [vmem:[%s1083_s2 + $0xb8] sm:$0xff]  ;;  %v45_v32 = vld [vmem:[%s1083_s2 + $0xa0] sm:$0xff]  ;;  %v47_v34 = vld [vmem:[%s1083_s2 + $0xb0] sm:$0xff] }
   0x9   :  { %v600_v31 = vpack.c.bf16 %v48_v29, %v44_v28  ;;  %v586_v35 = vpack.c.bf16 %v45_v32, %v41_v30  ;;  %v50_v36 = vld [vmem:[%s1083_s2 + $0xc8] sm:$0xff]  ;;  %v52_v38 = vld [vmem:[%s1083_s2 + $0xd8] sm:$0xff]  ;;  %v602_v39 = vpack.c.bf16 %v47_v34, %v43_v33  ;;  %v49_v42 = vld [vmem:[%s1083_s2 + $0xc0] sm:$0xff] }
   0xa   :  { %583 = vmatpush1.bf16.msra.mxu0 %v582_v22  ;;  %v54_v37 = vld [vmem:[%s1083_s2 + $0xe8] sm:$0xff]  ;;  %v56_v41 = vld [vmem:[%s1083_s2 + $0xf8] sm:$0xff]  ;;  %v53_v43 = vld [vmem:[%s1083_s2 + $0xe0] sm:$0xff] }
   0xb   :  { %599 = vmatpush1.bf16.msra.mxu1 %v598_v26  ;;  %585 = vmatprep.subr.bf16.mxu0 %v584_v27  ;;  %v588_v40 = vpack.c.bf16 %v54_v37, %v50_v36  ;;  %v604_v44 = vpack.c.bf16 %v56_v41, %v52_v38  ;;  %v51_v45 = vld [vmem:[%s1083_s2 + $0xd0] sm:$0xff]  ;;  %v590_v47 = vpack.c.bf16 %v53_v43, %v49_v42  ;;  %v58_v49 = vld [vmem:[%s1083_s2 + $0x108] sm:$0xff]  ;;  %v60_v50 = vld [vmem:[%s1083_s2 + $0x118] sm:$0xff] }
   0xc   :  { %601 = vmatprep.subr.bf16.mxu1 %v600_v31  ;;  %v55_v46 = vld [vmem:[%s1083_s2 + $0xf0] sm:$0xff]  ;;  %v249_v51 = vld [vmem:[%s1085_s4 + $0x80] sm:$0xff]  ;;  %v250_v53 = vld [vmem:[%s1085_s4 + $0x88] sm:$0xff] }
   0xd   :  { %v606_v48 = vpack.c.bf16 %v55_v46, %v51_v45  ;;  %v57_v52 = vld [vmem:[%s1083_s2 + $0x100] sm:$0xff]  ;;  %v282_v55 = vld [vmem:[%s1085_s4 + $0x188] sm:$0xff]  ;;  %v59_v56 = vld [vmem:[%s1083_s2 + $0x110] sm:$0xff]  ;;  %v608_v0 = vpack.c.bf16 %v250_v53, %v249_v51 }
   0xe   :  { %587 = vmatpush1.bf16.msra.mxu0 %v586_v35  ;;  %v281_v54 = vld [vmem:[%s1085_s4 + $0x180] sm:$0xff]  ;;  %v234_v58 = vld [vmem:[%s1085_s4 + $0x8] sm:$0xff]  ;;  %v251_v61 = vld [vmem:[%s1085_s4 + $0x90] sm:$0xff] }
   0xf   :  { %603 = vmatpush1.bf16.msra.mxu1 %v602_v39  ;;  %589 = vmatprep.subr.bf16.mxu0 %v588_v40  ;;  %v233_v57 = vld [vmem:[%s1085_s4] sm:$0xff]  ;;  %v266_v60 = vld [vmem:[%s1085_s4 + $0x108] sm:$0xff]  ;;  %v252_v62 = vld [vmem:[%s1085_s4 + $0x98] sm:$0xff]  ;;  %v640_v3 = vpack.c.bf16 %v282_v55, %v281_v54 }
  0x10   :  { %605 = vmatprep.subr.bf16.mxu1 %v604_v44  ;;  %v265_v59 = vld [vmem:[%s1085_s4 + $0x100] sm:$0xff]  ;;  %v283_v1 = vld [vmem:[%s1085_s4 + $0x190] sm:$0xff]  ;;  %v284_v2 = vld [vmem:[%s1085_s4 + $0x198] sm:$0xff]  ;;  %v610_v4 = vpack.c.bf16 %v234_v58, %v233_v57  ;;  %v612_v6 = vpack.c.bf16 %v252_v62, %v251_v61 }
  0x11   :  { %v24_v63 = vld [vmem:[%s1081_s0] sm:$0xff]  ;;  %v642_v5 = vpack.c.bf16 %v266_v60, %v265_v59  ;;  %v235_v8 = vld [vmem:[%s1085_s4 + $0x10] sm:$0xff]  ;;  %v236_v9 = vld [vmem:[%s1085_s4 + $0x18] sm:$0xff]  ;;  %v644_v11 = vpack.c.bf16 %v284_v2, %v283_v1 }
  0x12   :  { %591 = vmatpush1.bf16.msra.mxu0 %v590_v47  ;;  %v267_v10 = vld [vmem:[%s1085_s4 + $0x110] sm:$0xff]  ;;  %v268_v12 = vld [vmem:[%s1085_s4 + $0x118] sm:$0xff]  ;;  %v253_v13 = vld [vmem:[%s1085_s4 + $0xa0] sm:$0xff]  ;;  %v614_v17 = vpack.c.bf16 %v236_v9, %v235_v8 }
  0x13   :  { %607 = vmatpush1.bf16.msra.mxu1 %v606_v48  ;;  %103 = vmatprep.subr.mxu0 %v58_v49  ;;  %v254_v14 = vld [vmem:[%s1085_s4 + $0xa8] sm:$0xff]  ;;  %v285_v15 = vld [vmem:[%s1085_s4 + $0x1a0] sm:$0xff]  ;;  %v646_v18 = vpack.c.bf16 %v268_v12, %v267_v10  ;;  %v255_v25 = vld [vmem:[%s1085_s4 + $0xb0] sm:$0xff] }
  0x14   :  { %174 = vmatprep.subr.mxu1 %v60_v50  ;;  %v286_v16 = vld [vmem:[%s1085_s4 + $0x1a8] sm:$0xff]  ;;  %v616_v19 = vpack.c.bf16 %v254_v14, %v253_v13  ;;  %v237_v20 = vld [vmem:[%s1085_s4 + $0x20] sm:$0xff]  ;;  %v256_v26 = vld [vmem:[%s1085_s4 + $0xb8] sm:$0xff] }
  0x15   :  { %v238_v21 = vld [vmem:[%s1085_s4 + $0x28] sm:$0xff]  ;;  %v269_v22 = vld [vmem:[%s1085_s4 + $0x120] sm:$0xff]  ;;  %v648_v23 = vpack.c.bf16 %v286_v16, %v285_v15  ;;  %v287_v27 = vld [vmem:[%s1085_s4 + $0x1b0] sm:$0xff]  ;;  %v620_v31 = vpack.c.bf16 %v256_v26, %v255_v25 }
  0x16   :  { %104 = vmatpush1.msra.mxu0 %v57_v52  ;;  %v270_v24 = vld [vmem:[%s1085_s4 + $0x128] sm:$0xff]  ;;  %v288_v28 = vld [vmem:[%s1085_s4 + $0x1b8] sm:$0xff]  ;;  %v618_v29 = vpack.c.bf16 %v238_v21, %v237_v20  ;;  %v239_v32 = vld [vmem:[%s1085_s4 + $0x30] sm:$0xff] }
  0x17   :  { %175 = vmatpush1.msra.mxu1 %v59_v56  ;;  %502 = vmatmul.mubr.msk.f32.vlgmr.msra.gmra.mrb[0].mxu0 %vm83_vm0, %v24_v63  ;;  %v650_v30 = vpack.c.bf16 %v270_v24, %v269_v22  ;;  %v240_v33 = vld [vmem:[%s1085_s4 + $0x38] sm:$0xff]  ;;  %v271_v34 = vld [vmem:[%s1085_s4 + $0x130] sm:$0xff]  ;;  %v652_v35 = vpack.c.bf16 %v288_v28, %v287_v27  ;;  %v257_v37 = vld [vmem:[%s1085_s4 + $0xc0] sm:$0xff] }
  0x18   :  { %503 = vmatmul.mubr.msk.f32.vlgmr.msra.gmra.mrb[0].mxu1 %vm83_vm0, %v24_v63  ;;  %609 = vmatprep.subr.bf16.mxu0 %v608_v0  ;;  %v272_v36 = vld [vmem:[%s1085_s4 + $0x138] sm:$0xff]  ;;  %v258_v38 = vld [vmem:[%s1085_s4 + $0xc8] sm:$0xff]  ;;  %v289_v39 = vld [vmem:[%s1085_s4 + $0x1c0] sm:$0xff] }
  0x19   :  { %641 = vmatprep.subr.bf16.mxu1 %v640_v3  ;;  %611 = vmatpush3.bf16.msra.mxu0 %v610_v4  ;;  %v290_v40 = vld [vmem:[%s1085_s4 + $0x1c8] sm:$0xff] }
  0x1a   :  { %643 = vmatpush3.bf16.msra.mxu1 %v642_v5  ;;  %613 = vmatprep.subr.bf16.mxu0 %v612_v6 }
  0x1b   :  { %645 = vmatprep.subr.bf16.mxu1 %v644_v11 }
  0x1d   :  { %615 = vmatpush3.bf16.msra.mxu0 %v614_v17 }
  0x1e   :  { %647 = vmatpush3.bf16.msra.mxu1 %v646_v18  ;;  %617 = vmatprep.subr.bf16.mxu0 %v616_v19 }
  0x1f   :  { %649 = vmatprep.subr.bf16.mxu1 %v648_v23 }
  0x20   :  { %11 = vsyncpa [#allocation3], 0  ;;  %v622_v41 = vpack.c.bf16 %v240_v33, %v239_v32  ;;  %v654_v42 = vpack.c.bf16 %v272_v36, %v271_v34  ;;  %v624_v43 = vpack.c.bf16 %v258_v38, %v257_v37  ;;  %v241_v44 = vld [vmem:[%s1085_s4 + $0x40] sm:$0xff]  ;;  %v242_v45 = vld [vmem:[%s1085_s4 + $0x48] sm:$0xff]  ;;  %v656_v47 = vpack.c.bf16 %v290_v40, %v289_v39 }
  0x21   :  { %619 = vmatpush3.bf16.msra.mxu0 %v618_v29  ;;  %v273_v46 = vld [vmem:[%s1085_s4 + $0x140] sm:$0xff]  ;;  %v274_v48 = vld [vmem:[%s1085_s4 + $0x148] sm:$0xff]  ;;  %v259_v49 = vld [vmem:[%s1085_s4 + $0xd0] sm:$0xff]  ;;  %v626_v53 = vpack.c.bf16 %v242_v45, %v241_v44  ;;  %v63_v24 = vlaneseq  ;;  %vm444_vm1 = vcmask 31744   ;;  %vm482_vm3 = vcmask 39936  }
  0x22   :  { %651 = vmatpush3.bf16.msra.mxu1 %v650_v30  ;;  %621 = vmatprep.subr.bf16.mxu0 %v620_v31  ;;  %v260_v50 = vld [vmem:[%s1085_s4 + $0xd8] sm:$0xff]  ;;  %v291_v51 = vld [vmem:[%s1085_s4 + $0x1d0] sm:$0xff]  ;;  %v658_v54 = vpack.c.bf16 %v274_v48, %v273_v46  ;;  %v261_v61 = vld [vmem:[%s1085_s4 + $0xe0] sm:$0xff]  ;;  %vm484_vm4 = vcmask 48128   ;;  %vm486_vm5 = vcmask 56320  }
  0x23   :  { %653 = vmatprep.subr.bf16.mxu1 %v652_v35  ;;  %v292_v52 = vld [vmem:[%s1085_s4 + $0x1d8] sm:$0xff]  ;;  %v628_v55 = vpack.c.bf16 %v260_v50, %v259_v49  ;;  %v243_v56 = vld [vmem:[%s1085_s4 + $0x50] sm:$0xff]  ;;  %v262_v62 = vld [vmem:[%s1085_s4 + $0xe8] sm:$0xff]  ;;  %v64_v25 = vshrl.u32 %v63_v24, 7 }
  0x24   :  { %v244_v57 = vld [vmem:[%s1085_s4 + $0x58] sm:$0xff]  ;;  %v275_v58 = vld [vmem:[%s1085_s4 + $0x150] sm:$0xff]  ;;  %v660_v59 = vpack.c.bf16 %v292_v52, %v291_v51  ;;  %v293_v63 = vld [vmem:[%s1085_s4 + $0x1e0] sm:$0xff]  ;;  %v632_v3 = vpack.c.bf16 %v262_v62, %v261_v61 }
  0x25   :  { %623 = vmatpush3.bf16.msra.mxu0 %v622_v41  ;;  %v276_v60 = vld [vmem:[%s1085_s4 + $0x158] sm:$0xff]  ;;  %v294_v0 = vld [vmem:[%s1085_s4 + $0x1e8] sm:$0xff]  ;;  %v630_v1 = vpack.c.bf16 %v244_v57, %v243_v56  ;;  %v245_v5 = vld [vmem:[%s1085_s4 + $0x60] sm:$0xff]  ;;  %v65_v26 = vsub.s32 0, %v64_v25  ;;  %v73_v28 = vsub.s32 2, %v64_v25  ;;  %v69_v29 = vsub.s32 1, %v64_v25 }
  0x26   :  { %655 = vmatpush3.bf16.msra.mxu1 %v654_v42  ;;  %625 = vmatprep.subr.bf16.mxu0 %v624_v43  ;;  %v662_v2 = vpack.c.bf16 %v276_v60, %v275_v58  ;;  %v664_v4 = vpack.c.bf16 %v294_v0, %v293_v63  ;;  %v246_v6 = vld [vmem:[%s1085_s4 + $0x68] sm:$0xff]  ;;  %v277_v8 = vld [vmem:[%s1085_s4 + $0x160] sm:$0xff]  ;;  %v263_v12 = vld [vmem:[%s1085_s4 + $0xf0] sm:$0xff]  ;;  %v77_v30 = vsub.s32 3, %v64_v25  ;;  %v709_v58 = vmov 0  }
  0x27   :  { %657 = vmatprep.subr.bf16.mxu1 %v656_v47  ;;  %v634_v9 = vpack.c.bf16 %v246_v6, %v245_v5  ;;  %v278_v10 = vld [vmem:[%s1085_s4 + $0x168] sm:$0xff]  ;;  %v264_v13 = vld [vmem:[%s1085_s4 + $0xf8] sm:$0xff]  ;;  %v295_v14 = vld [vmem:[%s1085_s4 + $0x1f0] sm:$0xff]  ;;  %676 = vset.pattern.permute.xlu1 %v709_v58 }
  0x28   :  { %v666_v11 = vpack.c.bf16 %v278_v10, %v277_v8  ;;  %v636_v15 = vpack.c.bf16 %v264_v13, %v263_v12  ;;  %v296_v16 = vld [vmem:[%s1085_s4 + $0x1f8] sm:$0xff]  ;;  %v247_v17 = vld [vmem:[%s1085_s4 + $0x70] sm:$0xff]  ;;  %v61_v27 = vld [vmem:[%s1084_s3] sm:$0xf]  ;;  %677 = vset.pattern.permute.xlu0 %v709_v58 }
  0x29   :  { %627 = vmatpush3.bf16.msra.mxu0 %v626_v53  ;;  %v248_v18 = vld [vmem:[%s1085_s4 + $0x78] sm:$0xff]  ;;  %v668_v19 = vpack.c.bf16 %v296_v16, %v295_v14  ;;  %v279_v21 = vld [vmem:[%s1085_s4 + $0x170] sm:$0xff]  ;;  %v66_v31 = vrot.slane %v61_v27, %v65_v26  ;;  %v74_v32 = vrot.slane %v61_v27, %v73_v28  ;;  %v70_v33 = vrot.slane %v61_v27, %v69_v29  ;;  %v504_v49 = vld [vmem:[%s1086_s5] ss:$0 sm:$0xff]  ;;  %s711_s5 = smov [#allocation2]  }
  0x2a   :  { %659 = vmatpush3.bf16.msra.mxu1 %v658_v54  ;;  %629 = vmatprep.subr.bf16.mxu0 %v628_v55  ;;  %v638_v20 = vpack.c.bf16 %v248_v18, %v247_v17  ;;  %v280_v22 = vld [vmem:[%s1085_s4 + $0x178] sm:$0xff]  ;;  %v78_v34 = vrot.slane %v61_v27, %v77_v30  ;;  %v461_v57 = vld [vmem:[%s1082_s1] sm:$0xff]  ;;  %s710_s1 = smov 1   ;;  %s494_s25 = sshll.u32 %s711_s5, 4  ;;  %s495_s25 = int_to_ptr.vmem [resolvable:$true] %s494_s25 }
  0x2b   :  { %661 = vmatprep.subr.bf16.mxu1 %v660_v59  ;;  %v670_v23 = vpack.c.bf16 %v280_v22, %v279_v21  ;;  %463 = vperm.xlu1 %676, %v461_v57   ;;  %s684_s26 = scalar_lea.vmem %s495_s25, 128  ;;  %p689_p1 = scmp.lt.s32.totalorder %s495_s25, %s495_s25 }
  0x2c   :  { %p685_p0 = scmp.ne.s32.totalorder %s495_s25, %s684_s26  ;;  %p690_p2 = scmp.lt.s32.totalorder %s684_s26, %s684_s26 }
  0x2d   :  { %631 = vmatpush3.bf16.msra.mxu0 %v630_v1  ;;  %v460_v1 = vand.u32 127, %v63_v24 }
  0x2e   :  { %663 = vmatpush3.bf16.msra.mxu1 %v662_v2  ;;  %633 = vmatprep.subr.bf16.mxu0 %v632_v3  ;;  %p691_p3 = por %p690_p2, %p689_p1 }
  0x2f   :  { %665 = vmatprep.subr.bf16.mxu1 %v664_v4 }
  0x30   :  { %p692_p4 = pnand %p691_p3, %p685_p0 }
  0x31   :  { %635 = vmatpush3.bf16.msra.mxu0 %v634_v9 }
  0x32   :  { %667 = vmatpush3.bf16.msra.mxu1 %v666_v11  ;;  %637 = vmatprep.subr.bf16.mxu0 %v636_v15 }
  0x33   :  { %669 = vmatprep.subr.bf16.mxu1 %v668_v19 }
  0x35   :  { %639 = vmatpush3.bf16.msra.mxu0 %v638_v20 }
  0x36   :  { %671 = vmatpush3.bf16.msra.mxu1 %v670_v23 }
  0xaa   :  { %v464_v2 = vpop.permute.xlu1 %463 }
  0xab   :  { %vm465_vm2 = vcmp.eq.s32.totalorder %v460_v1, %v464_v2 }
  0xac   :  { %v505_v6 = vsel %vm465_vm2, 1.0, %v708_v7 }
  0xea   :  { %v153_v35 = vpop.f32.mrb[0].mxu0 }
  0xeb   :  { %v154_v36 = vadd.f32 %v153_v35, %v66_v31  ;;  %v224_v37 = vpop.f32.mrb[0].mxu1  ;;  %v155_v38 = vpop.f32.mrb[1].mxu0 }
  0xec   :  { %v225_v39 = vadd.f32 %v224_v37, %v74_v32  ;;  %v156_v40 = vadd.f32 %v155_v38, %v70_v33  ;;  %v226_v41 = vpop.f32.mrb[1].mxu1 }
  0xed   :  { %v227_v42 = vadd.f32 %v226_v41, %v78_v34  ;;  %v229_v45 = vmax.f32 %v154_v36, 0.0 }
  0xee   :  { %v231_v43 = vmax.f32 %v225_v39, 0.0  ;;  %v230_v44 = vmax.f32 %v156_v40, 0.0 }
  0xef   :  { %v232_v46 = vmax.f32 %v227_v42, 0.0 }
  0xf0   :  { %368 = vmatprep.mubr.f32.mxu0 %v230_v44 }
  0xf1   :  { %438 = vmatprep.mubr.f32.mxu1 %v232_v46  ;;  %369 = vmatmul.mubr.f32.vlgmr.msra.gmra.mrb[2].mxu0 %v229_v45 }
  0xf2   :  { %439 = vmatmul.mubr.f32.vlgmr.msra.gmra.mrb[2].mxu1 %v231_v43 }
 0x1c4   :  { %v538_v47 = vpop.f32.mrb[2].mxu0 }
 0x1c5   :  { %v573_v48 = vpop.f32.mrb[2].mxu1  ;;  %v539_v50 = vpop.f32.mrb[3].mxu0 }
 0x1c6   :  { %v540_v51 = vadd.f32 %v539_v50, %v538_v47  ;;  %v574_v52 = vpop.f32.mrb[3].mxu1 }
 0x1c7   :  { %v575_v53 = vadd.f32 %v574_v52, %v573_v48 }
 0x1c8   :  { %v371_v54 = vadd.f32 %v540_v51, %v504_v49 }
 0x1ca   :  { %v441_v55 = vadd.f32 %v575_v53, %v371_v54 }
 0x1cc   :  { %v445_v56 = vsel %vm444_vm1, %v441_v55, -inf }
 0x1cd   :  { %446 = vmax.xlane.f32.xlu0 %v445_v56 }
 0x25a   :  { %v447_v59 = vpop.xlane.xlu0 %446 }
 0x25b   :  { %v448_v60 = vsub.f32 %v441_v55, %v447_v59 }
 0x25d   :  { %v449_v61 = vmul.f32 1.442695, %v448_v60 }
 0x25f   :  { %678 = vpow2.f32 %v449_v61 }
 0x269   :  { %v679_v62 = vpop.eup %678 }
 0x26a   :  { %v451_v63 = vsel %vm444_vm1, %v679_v62, 0.0 }
 0x26b   :  { %452 = vadd.xlane.f32.xlu0 %v451_v63 }
 0x2f8   :  { %v453_v0 = vpop.xlane.xlu0 %452 }
 0x2f9   :  { %680 = vrcp.f32 %v453_v0 }
 0x2fa   :  { %682 = vlog2.f32 %v453_v0 }
 0x303   :  { %v681_v3 = vpop.eup %680 }
 0x304   :  { %v683_v4 = vpop.eup %682  ;;  %v455_v9 = vmul.f32 %v681_v3, %v679_v62 }
 0x305   :  { %v457_v5 = vmul.f32 0.6931472, %v683_v4 }
 0x307   :  { %v458_v8 = vsub.f32 %v448_v60, %v457_v5 }
 0x309   :  { %v468_v10 = vmul.f32 %v505_v6, %v458_v8  ;;  %v472_v11 = vmul.f32 %v458_v8, %v455_v9 }
 0x30b   :  { %v469_v12 = vsel %vm444_vm1, %v468_v10, 0.0  ;;  %v473_v13 = vsel %vm444_vm1, %v472_v11, 0.0 }
 0x30c   :  { %470 = vadd.xlane.f32.xlu1 %v469_v12  ;;  %474 = vadd.xlane.f32.xlu0 %v473_v13 }
 0x322   :  { %478 = vrot.lane.b32.xlu0 %v441_v55, %s710_s1 }
 0x399   :  { %v475_v14 = vpop.xlane.xlu0 %474  ;;  %v471_v15 = vpop.xlane.xlu1 %470 }
 0x39a   :  { %v481_v7 = vsel %vm444_vm1, %v455_v9, %v471_v15  ;;  %v476_v16 = vsub.f32 0.0, %v475_v14 }
 0x39d   :  { %v479_v17 = vpop.permute.xlu0 %478 }
 0x39e   :  { %v483_v18 = vsel %vm482_vm3, %v481_v7, %v479_v17 }
 0x39f   :  { %v485_v19 = vsel %vm484_vm4, %v483_v18, %v476_v16 }
 0x3a0   :  { %487 = vst.msk [vmem:[#allocation2] sm:$0xff] %vm486_vm5, %v485_v19 }
 0x3a1   :  { %695 = shalt.err (!%p692_p4)
}
 0x3a2   :  { %s696_s29 = scalar_lea.hbm %s1087_s6, 128 }
 0x3a3   :  { %p697_p5 = scmp.ne.s32.totalorder %s1087_s6, %s696_s29  ;;  %p700_p6 = scmp.lt.u32.totalorder %s696_s29, %s1087_s6 }
 0x3a5   :  { %p702_p7 = pnand %p700_p6, %p697_p5 }
 0x3a7   :  { %705 = shalt.err (!%p702_p7)
}
 0x3a8   :  { %497 = dma.vmem_to_hbm [thread:$0]  %s495_s25, 128, %s1087_s6, [#allocation3]  }
 0x3a9   :  { %706 = dma.done.wait [#allocation3], 128  }
 0x3aa   :  { %707 = vsyncadd [#allocation3], 4294967168 }
 0x3ab   :  { %501 = vsyncpa [#allocation3], 1 }

</bundles_post_ra>
